<compile_context>
chip_gen: v7x
topology: tpu7x:2x2x1
jax: 0.10.0
libtpu: 0.0.40
codegen_flags: <defaults>
</compile_context>

<pallas_src>
import jax
import jax.numpy as jnp
from jax.experimental import pallas as pl
from jax.experimental.pallas import tpu as pltpu

LANE = 128      # f32 lane tile (last dim)
SUBLANE = 8     # f32 sublane tile (second-to-last dim)
_LN_EPS = 1e-5  # nn.LayerNorm default


def _round_up(n, m):
    return ((n + m - 1) // m) * m


def _pad_to(x, shape):
    pads = [(0, t - s) for s, t in zip(x.shape, shape)]
    return jnp.pad(x, pads)


# ----------------------------------------------------------------------------
# Fused kernel (built per layer-count; layer loop is unrolled at trace time)
# ----------------------------------------------------------------------------
def _make_actor_kernel(num_hidden, hidden_true_dims):
    """Fused (Linear->ReLU->LayerNorm->Dropout)*N -> Linear->Tanh kernel."""

    def kernel(*refs):
        # refs = [x] + [w,b,gamma,beta]*num_hidden + [w_head, b_head] + [o_ref]
        x = refs[0][...]
        idx = 1
        for li in range(num_hidden):
            w = refs[idx][...]
            b = refs[idx + 1][...]
            g = refs[idx + 2][...]
            beta = refs[idx + 3][...]
            idx += 4

            y = jnp.dot(x, w, preferred_element_type=jnp.float32) + b
            y = jnp.maximum(y, 0.0)                          # ReLU

            # LayerNorm over the true (unpadded) features.  Padded lanes of y
            # are exactly 0 (zero W columns, zero bias, ReLU), so the sums
            # need only be divided by the true feature count.
            d = float(hidden_true_dims[li])
            mean = jnp.sum(y, axis=-1, keepdims=True) / d
            mean_sq = jnp.sum(y * y, axis=-1, keepdims=True) / d
            var = mean_sq - mean * mean                      # one-pass variance
            y_hat = (y - mean) * jax.lax.rsqrt(var + _LN_EPS)

            # gamma/beta are zero in padded lanes -> padded lanes stay exactly 0.
            x = y_hat * g + beta
            # Dropout(0.1) eval mode == identity.
            # TODO(synk): training-mode dropout (stochastic mask) not implemented.

        wh = refs[idx][...]
        bh = refs[idx + 1][...]
        o_ref = refs[idx + 2]
        y = jnp.dot(x, wh, preferred_element_type=jnp.float32) + bh
        o_ref[...] = jnp.tanh(y).astype(o_ref.dtype)

    return kernel


# ----------------------------------------------------------------------------
# Parameter construction (mirrors Actor.__init__: orthogonal W, zero bias,
# LayerNorm gamma=1 / beta=0).  Weights stored as [in, out] (transposed vs.
# PyTorch) and zero-padded to lane-aligned shapes.
# ----------------------------------------------------------------------------
def init_actor_params(key, state_dim, action_dim, hidden_dims):
    ortho = jax.nn.initializers.orthogonal(scale=1.0)
    dims = [state_dim] + list(hidden_dims)
    dims_pad = [_round_up(d, LANE) for d in dims]
    a_pad = _round_up(action_dim, LANE)

    layers = []
    for i in range(len(hidden_dims)):
        key, wk = jax.random.split(key)
        d_in, d_out = dims[i], dims[i + 1]
        w_pt = ortho(wk, (d_out, d_in), jnp.float32)          # PyTorch [out, in]
        layers.append(dict(
            w=_pad_to(w_pt.T, (dims_pad[i], dims_pad[i + 1])),        # [in_p, out_p]
            b=jnp.zeros((1, dims_pad[i + 1]), jnp.float32),
            gamma=_pad_to(jnp.ones((1, d_out), jnp.float32), (1, dims_pad[i + 1])),
            beta=jnp.zeros((1, dims_pad[i + 1]), jnp.float32),
        ))

    key, wk = jax.random.split(key)
    w_pt = ortho(wk, (action_dim, hidden_dims[-1]), jnp.float32)
    head = dict(
        w=_pad_to(w_pt.T, (dims_pad[-1], a_pad)),
        b=jnp.zeros((1, a_pad), jnp.float32),
    )

    meta = dict(state_dim=state_dim, action_dim=action_dim,
                hidden_dims=tuple(hidden_dims),
                state_pad=dims_pad[0], action_pad=a_pad)
    return dict(layers=layers, head=head, meta=meta)


# ----------------------------------------------------------------------------
# Forward: one pallas_call for the whole network
# ----------------------------------------------------------------------------
def actor_forward(params, state, *, batch_tile=256):
    """state: [batch, state_dim] -> actions: [batch, action_dim] in (-1, 1)."""
    meta = params["meta"]
    B, sdim = state.shape
    assert sdim == meta["state_dim"]

    # Pad batch to sublane multiple, pick a batch tile, and make it divide.
    b_pad = max(SUBLANE, _round_up(B, SUBLANE))
    tile = min(_round_up(batch_tile, SUBLANE), b_pad)
    b_pad = _round_up(b_pad, tile)
    grid = (b_pad // tile,)

    x = _pad_to(state.astype(jnp.float32), (b_pad, meta["state_pad"]))

    inputs = [x]
    in_specs = [pl.BlockSpec((tile, meta["state_pad"]), lambda i: (i, 0))]

    def _resident_spec(shape):
        # Weights / bias / gamma / beta: full-array block, same block index at
        # every grid step -> stays resident in VMEM across the batch grid.
        return pl.BlockSpec(shape, lambda i: tuple(0 for _ in shape))

    for layer in params["layers"]:
        for name in ("w", "b", "gamma", "beta"):
            arr = layer[name]
            inputs.append(arr)
            in_specs.append(_resident_spec(arr.shape))
    for name in ("w", "b"):
        arr = params["head"][name]
        inputs.append(arr)
        in_specs.append(_resident_spec(arr.shape))

    a_pad = meta["action_pad"]
    kernel = _make_actor_kernel(len(params["layers"]), meta["hidden_dims"])

    out = pl.pallas_call(
        kernel,
        out_shape=jax.ShapeDtypeStruct((b_pad, a_pad), jnp.float32),
        grid=grid,
        in_specs=in_specs,
        out_specs=pl.BlockSpec((tile, a_pad), lambda i: (i, 0)),  # lane-dense slab
        compiler_params=pltpu.CompilerParams(
            dimension_semantics=("parallel",)),
    )(*inputs)

    return out[:B, :meta["action_dim"]]


# ----------------------------------------------------------------------------
# Pure-JAX reference (unpadded) for correctness checking
# ----------------------------------------------------------------------------
def actor_forward_ref(params, state):
    meta = params["meta"]
    dims = [meta["state_dim"]] + list(meta["hidden_dims"])
    x = state
    for i, layer in enumerate(params["layers"]):
        d_in, d_out = dims[i], dims[i + 1]
        y = x @ layer["w"][:d_in, :d_out] + layer["b"][:, :d_out]
        y = jnp.maximum(y, 0.0)
        mean = jnp.mean(y, axis=-1, keepdims=True)
        var = jnp.mean((y - mean) ** 2, axis=-1, keepdims=True)
        y_hat = (y - mean) * jax.lax.rsqrt(var + _LN_EPS)
        x = y_hat * layer["gamma"][:, :d_out] + layer["beta"][:, :d_out]
    d_in, d_out = dims[-1], meta["action_dim"]
    y = x @ params["head"]["w"][:d_in, :d_out] + params["head"]["b"][:, :d_out]
    return jnp.tanh(y)


# ----------------------------------------------------------------------------
if __name__ == "__main__":
    state_dim = 16
    action_dim = 8
    hidden_dims = [32, 32]
    batch = 4

    key = jax.random.PRNGKey(0)
    pkey, xkey = jax.random.split(key)

    params = init_actor_params(pkey, state_dim, action_dim, hidden_dims)
    state = jax.random.normal(xkey, (batch, state_dim), dtype=jnp.float32)

    actions = actor_forward(params, state)
    jax.block_until_ready(actions)

    ref = actor_forward_ref(params, state)

    assert actions.shape == (batch, action_dim)
    assert bool(jnp.all(jnp.abs(actions) <= 1.0))
    assert bool(jnp.allclose(actions, ref, atol=1e-2, rtol=1e-2))
    print("KERNEL_OK")
</pallas_src>

<mosaic_0001>
module attributes {stable_mosaic.version = 11 : i64} {
  func.func @kernel(%arg0: i32, %arg1: memref<8x128xf32, #tpu.memory_space<vmem>>, %arg2: memref<128x128xf32, #tpu.memory_space<vmem>>, %arg3: memref<1x128xf32, #tpu.memory_space<vmem>>, %arg4: memref<1x128xf32, #tpu.memory_space<vmem>>, %arg5: memref<1x128xf32, #tpu.memory_space<vmem>>, %arg6: memref<128x128xf32, #tpu.memory_space<vmem>>, %arg7: memref<1x128xf32, #tpu.memory_space<vmem>>, %arg8: memref<1x128xf32, #tpu.memory_space<vmem>>, %arg9: memref<1x128xf32, #tpu.memory_space<vmem>>, %arg10: memref<128x128xf32, #tpu.memory_space<vmem>>, %arg11: memref<1x128xf32, #tpu.memory_space<vmem>>, %arg12: memref<8x128xf32, #tpu.memory_space<vmem>>) attributes {dimension_semantics = [#tpu.dimension_semantics<parallel>], iteration_bounds = array<i64: 1>, scalar_prefetch = 0 : i64, scratch_operands = 0 : i64, tpu.core_type = #tpu.core_type<tc>, window_params = [{transform_indices = @transform_0, window_bounds = array<i64: 8, 128>}, {pipeline_mode = #tpu.pipeline_mode<synchronous>, transform_indices = @transform_1, window_bounds = array<i64: 128, 128>}, {pipeline_mode = #tpu.pipeline_mode<synchronous>, transform_indices = @transform_2, window_bounds = array<i64: 1, 128>}, {pipeline_mode = #tpu.pipeline_mode<synchronous>, transform_indices = @transform_3, window_bounds = array<i64: 1, 128>}, {pipeline_mode = #tpu.pipeline_mode<synchronous>, transform_indices = @transform_4, window_bounds = array<i64: 1, 128>}, {pipeline_mode = #tpu.pipeline_mode<synchronous>, transform_indices = @transform_5, window_bounds = array<i64: 128, 128>}, {pipeline_mode = #tpu.pipeline_mode<synchronous>, transform_indices = @transform_6, window_bounds = array<i64: 1, 128>}, {pipeline_mode = #tpu.pipeline_mode<synchronous>, transform_indices = @transform_7, window_bounds = array<i64: 1, 128>}, {pipeline_mode = #tpu.pipeline_mode<synchronous>, transform_indices = @transform_8, window_bounds = array<i64: 1, 128>}, {pipeline_mode = #tpu.pipeline_mode<synchronous>, transform_indices = @transform_9, window_bounds = array<i64: 128, 128>}, {pipeline_mode = #tpu.pipeline_mode<synchronous>, transform_indices = @transform_10, window_bounds = array<i64: 1, 128>}, {transform_indices = @transform_11, window_bounds = array<i64: 8, 128>}]} {
    %c0 = arith.constant 0 : index
    %c0_0 = arith.constant 0 : index
    %0 = vector.load %arg1[%c0, %c0_0] : memref<8x128xf32, #tpu.memory_space<vmem>>, vector<8x128xf32>
    %c0_1 = arith.constant 0 : index
    %c0_2 = arith.constant 0 : index
    %1 = vector.load %arg2[%c0_1, %c0_2] : memref<128x128xf32, #tpu.memory_space<vmem>>, vector<128x128xf32>
    %c0_3 = arith.constant 0 : index
    %c0_4 = arith.constant 0 : index
    %2 = vector.load %arg3[%c0_3, %c0_4] : memref<1x128xf32, #tpu.memory_space<vmem>>, vector<1x128xf32>
    %c0_5 = arith.constant 0 : index
    %c0_6 = arith.constant 0 : index
    %3 = vector.load %arg4[%c0_5, %c0_6] : memref<1x128xf32, #tpu.memory_space<vmem>>, vector<1x128xf32>
    %c0_7 = arith.constant 0 : index
    %c0_8 = arith.constant 0 : index
    %4 = vector.load %arg5[%c0_7, %c0_8] : memref<1x128xf32, #tpu.memory_space<vmem>>, vector<1x128xf32>
    %cst = arith.constant dense<0.000000e+00> : vector<8x128xf32>
    %5 = tpu.matmul %0, %1, %cst {dimension_numbers = #tpu.dot_dimension_numbers<[1], [0], [0], [1], [0, 0, 1, 1], [], []>} : vector<8x128xf32>, vector<128x128xf32>, vector<8x128xf32> -> vector<8x128xf32>
    %6 = vector.broadcast %2 : vector<1x128xf32> to vector<8x128xf32>
    %7 = arith.addf %5, %6 : vector<8x128xf32>
    %cst_9 = arith.constant 0.000000e+00 : f32
    %8 = vector.broadcast %cst_9 : f32 to vector<8x128xf32>
    %9 = arith.maximumf %7, %8 : vector<8x128xf32>
    %cst_10 = arith.constant dense<0.000000e+00> : vector<8xf32>
    %10 = vector.multi_reduction <add>, %9, %cst_10 [1] : vector<8x128xf32> to vector<8xf32>
    %11 = vector.shape_cast %10 : vector<8xf32> to vector<8x1xf32>
    %cst_11 = arith.constant 3.200000e+01 : f32
    %12 = vector.broadcast %cst_11 : f32 to vector<8x1xf32>
    %13 = arith.divf %11, %12 : vector<8x1xf32>
    %14 = arith.mulf %9, %9 : vector<8x128xf32>
    %cst_12 = arith.constant dense<0.000000e+00> : vector<8xf32>
    %15 = vector.multi_reduction <add>, %14, %cst_12 [1] : vector<8x128xf32> to vector<8xf32>
    %16 = vector.shape_cast %15 : vector<8xf32> to vector<8x1xf32>
    %cst_13 = arith.constant 3.200000e+01 : f32
    %17 = vector.broadcast %cst_13 : f32 to vector<8x1xf32>
    %18 = arith.divf %16, %17 : vector<8x1xf32>
    %19 = arith.mulf %13, %13 : vector<8x1xf32>
    %20 = arith.subf %18, %19 : vector<8x1xf32>
    %21 = vector.broadcast %13 : vector<8x1xf32> to vector<8x128xf32>
    %22 = arith.subf %9, %21 : vector<8x128xf32>
    %cst_14 = arith.constant 9.99999974E-6 : f32
    %23 = vector.broadcast %cst_14 : f32 to vector<8x1xf32>
    %24 = arith.addf %20, %23 : vector<8x1xf32>
    %25 = math.rsqrt %24 : vector<8x1xf32>
    %26 = vector.broadcast %25 : vector<8x1xf32> to vector<8x128xf32>
    %27 = arith.mulf %22, %26 : vector<8x128xf32>
    %28 = vector.broadcast %3 : vector<1x128xf32> to vector<8x128xf32>
    %29 = arith.mulf %27, %28 : vector<8x128xf32>
    %30 = vector.broadcast %4 : vector<1x128xf32> to vector<8x128xf32>
    %31 = arith.addf %29, %30 : vector<8x128xf32>
    %c0_15 = arith.constant 0 : index
    %c0_16 = arith.constant 0 : index
    %32 = vector.load %arg6[%c0_15, %c0_16] : memref<128x128xf32, #tpu.memory_space<vmem>>, vector<128x128xf32>
    %c0_17 = arith.constant 0 : index
    %c0_18 = arith.constant 0 : index
    %33 = vector.load %arg7[%c0_17, %c0_18] : memref<1x128xf32, #tpu.memory_space<vmem>>, vector<1x128xf32>
    %c0_19 = arith.constant 0 : index
    %c0_20 = arith.constant 0 : index
    %34 = vector.load %arg8[%c0_19, %c0_20] : memref<1x128xf32, #tpu.memory_space<vmem>>, vector<1x128xf32>
    %c0_21 = arith.constant 0 : index
    %c0_22 = arith.constant 0 : index
    %35 = vector.load %arg9[%c0_21, %c0_22] : memref<1x128xf32, #tpu.memory_space<vmem>>, vector<1x128xf32>
    %cst_23 = arith.constant dense<0.000000e+00> : vector<8x128xf32>
    %36 = tpu.matmul %31, %32, %cst_23 {dimension_numbers = #tpu.dot_dimension_numbers<[1], [0], [0], [1], [0, 0, 1, 1], [], []>} : vector<8x128xf32>, vector<128x128xf32>, vector<8x128xf32> -> vector<8x128xf32>
    %37 = vector.broadcast %33 : vector<1x128xf32> to vector<8x128xf32>
    %38 = arith.addf %36, %37 : vector<8x128xf32>
    %cst_24 = arith.constant 0.000000e+00 : f32
    %39 = vector.broadcast %cst_24 : f32 to vector<8x128xf32>
    %40 = arith.maximumf %38, %39 : vector<8x128xf32>
    %cst_25 = arith.constant dense<0.000000e+00> : vector<8xf32>
    %41 = vector.multi_reduction <add>, %40, %cst_25 [1] : vector<8x128xf32> to vector<8xf32>
    %42 = vector.shape_cast %41 : vector<8xf32> to vector<8x1xf32>
    %cst_26 = arith.constant 3.200000e+01 : f32
    %43 = vector.broadcast %cst_26 : f32 to vector<8x1xf32>
    %44 = arith.divf %42, %43 : vector<8x1xf32>
    %45 = arith.mulf %40, %40 : vector<8x128xf32>
    %cst_27 = arith.constant dense<0.000000e+00> : vector<8xf32>
    %46 = vector.multi_reduction <add>, %45, %cst_27 [1] : vector<8x128xf32> to vector<8xf32>
    %47 = vector.shape_cast %46 : vector<8xf32> to vector<8x1xf32>
    %cst_28 = arith.constant 3.200000e+01 : f32
    %48 = vector.broadcast %cst_28 : f32 to vector<8x1xf32>
    %49 = arith.divf %47, %48 : vector<8x1xf32>
    %50 = arith.mulf %44, %44 : vector<8x1xf32>
    %51 = arith.subf %49, %50 : vector<8x1xf32>
    %52 = vector.broadcast %44 : vector<8x1xf32> to vector<8x128xf32>
    %53 = arith.subf %40, %52 : vector<8x128xf32>
    %cst_29 = arith.constant 9.99999974E-6 : f32
    %54 = vector.broadcast %cst_29 : f32 to vector<8x1xf32>
    %55 = arith.addf %51, %54 : vector<8x1xf32>
    %56 = math.rsqrt %55 : vector<8x1xf32>
    %57 = vector.broadcast %56 : vector<8x1xf32> to vector<8x128xf32>
    %58 = arith.mulf %53, %57 : vector<8x128xf32>
    %59 = vector.broadcast %34 : vector<1x128xf32> to vector<8x128xf32>
    %60 = arith.mulf %58, %59 : vector<8x128xf32>
    %61 = vector.broadcast %35 : vector<1x128xf32> to vector<8x128xf32>
    %62 = arith.addf %60, %61 : vector<8x128xf32>
    %c0_30 = arith.constant 0 : index
    %c0_31 = arith.constant 0 : index
    %63 = vector.load %arg10[%c0_30, %c0_31] : memref<128x128xf32, #tpu.memory_space<vmem>>, vector<128x128xf32>
    %c0_32 = arith.constant 0 : index
    %c0_33 = arith.constant 0 : index
    %64 = vector.load %arg11[%c0_32, %c0_33] : memref<1x128xf32, #tpu.memory_space<vmem>>, vector<1x128xf32>
    %cst_34 = arith.constant dense<0.000000e+00> : vector<8x128xf32>
    %65 = tpu.matmul %62, %63, %cst_34 {dimension_numbers = #tpu.dot_dimension_numbers<[1], [0], [0], [1], [0, 0, 1, 1], [], []>} : vector<8x128xf32>, vector<128x128xf32>, vector<8x128xf32> -> vector<8x128xf32>
    %66 = vector.broadcast %64 : vector<1x128xf32> to vector<8x128xf32>
    %67 = arith.addf %65, %66 : vector<8x128xf32>
    %68 = math.tanh %67 : vector<8x128xf32>
    %c0_35 = arith.constant 0 : index
    %c0_36 = arith.constant 0 : index
    %69 = vector.load %arg12[%c0_35, %c0_36] : memref<8x128xf32, #tpu.memory_space<vmem>>, vector<8x128xf32>
    tpu.vector_store %arg12[%c0_35, %c0_36], %68 {strides = array<i32>} : memref<8x128xf32, #tpu.memory_space<vmem>>, vector<8x128xf32>,
    return
  }
  func.func @transform_0(%arg0: i32) -> (i32, i32) {
    %c0_i32 = arith.constant 0 : i32
    %c0_i32_0 = arith.constant 0 : i32
    return %arg0, %c0_i32 : i32, i32
  }
  func.func @transform_1(%arg0: i32) -> (i32, i32) {
    %c0_i32 = arith.constant 0 : i32
    %c0_i32_0 = arith.constant 0 : i32
    %c0_i32_1 = arith.constant 0 : i32
    return %c0_i32, %c0_i32_0 : i32, i32
  }
  func.func @transform_2(%arg0: i32) -> (i32, i32) {
    %c0_i32 = arith.constant 0 : i32
    %c0_i32_0 = arith.constant 0 : i32
    %c0_i32_1 = arith.constant 0 : i32
    return %c0_i32, %c0_i32_0 : i32, i32
  }
  func.func @transform_3(%arg0: i32) -> (i32, i32) {
    %c0_i32 = arith.constant 0 : i32
    %c0_i32_0 = arith.constant 0 : i32
    %c0_i32_1 = arith.constant 0 : i32
    return %c0_i32, %c0_i32_0 : i32, i32
  }
  func.func @transform_4(%arg0: i32) -> (i32, i32) {
    %c0_i32 = arith.constant 0 : i32
    %c0_i32_0 = arith.constant 0 : i32
    %c0_i32_1 = arith.constant 0 : i32
    return %c0_i32, %c0_i32_0 : i32, i32
  }
  func.func @transform_5(%arg0: i32) -> (i32, i32) {
    %c0_i32 = arith.constant 0 : i32
    %c0_i32_0 = arith.constant 0 : i32
    %c0_i32_1 = arith.constant 0 : i32
    return %c0_i32, %c0_i32_0 : i32, i32
  }
  func.func @transform_6(%arg0: i32) -> (i32, i32) {
    %c0_i32 = arith.constant 0 : i32
    %c0_i32_0 = arith.constant 0 : i32
    %c0_i32_1 = arith.constant 0 : i32
    return %c0_i32, %c0_i32_0 : i32, i32
  }
  func.func @transform_7(%arg0: i32) -> (i32, i32) {
    %c0_i32 = arith.constant 0 : i32
    %c0_i32_0 = arith.constant 0 : i32
    %c0_i32_1 = arith.constant 0 : i32
    return %c0_i32, %c0_i32_0 : i32, i32
  }
  func.func @transform_8(%arg0: i32) -> (i32, i32) {
    %c0_i32 = arith.constant 0 : i32
    %c0_i32_0 = arith.constant 0 : i32
    %c0_i32_1 = arith.constant 0 : i32
    return %c0_i32, %c0_i32_0 : i32, i32
  }
  func.func @transform_9(%arg0: i32) -> (i32, i32) {
    %c0_i32 = arith.constant 0 : i32
    %c0_i32_0 = arith.constant 0 : i32
    %c0_i32_1 = arith.constant 0 : i32
    return %c0_i32, %c0_i32_0 : i32, i32
  }
  func.func @transform_10(%arg0: i32) -> (i32, i32) {
    %c0_i32 = arith.constant 0 : i32
    %c0_i32_0 = arith.constant 0 : i32
    %c0_i32_1 = arith.constant 0 : i32
    return %c0_i32, %c0_i32_0 : i32, i32
  }
  func.func @transform_11(%arg0: i32) -> (i32, i32) {
    %c0_i32 = arith.constant 0 : i32
    %c0_i32_0 = arith.constant 0 : i32
    return %arg0, %c0_i32 : i32, i32
  }
}

</mosaic_0001>

<bundles_post_ra>
// kernel: tpu_custom_call.1
= control target key start
LH: loop header
LB: loop body
LE: loop exit
PB: predicated region body
PF: predicated region fallthrough
CT: control target
= control target key end

     0   :  { %16 = vsyncpa [#allocation3], 0  ;;  %s1008_s0 = inlined_call_operand.hbm [shape: f32[8,128], index: 0, kind: input, shape index: {}]   ;;  %s1009_s1 = inlined_call_operand.hbm [shape: f32[128,128], index: 1, kind: input, shape index: {}]   ;;  %s1010_s2 = inlined_call_operand.vmem [shape: f32[1,128], index: 2, kind: input, shape index: {}]   ;;  %s1011_s3 = inlined_call_operand.vmem [shape: f32[1,128], index: 3, kind: input, shape index: {}]   ;;  %s1012_s4 = inlined_call_operand.vmem [shape: f32[1,128], index: 4, kind: input, shape index: {}]   ;;  %s1013_s5 = inlined_call_operand.hbm [shape: f32[128,128], index: 5, kind: input, shape index: {}]   ;;  %s1014_s6 = inlined_call_operand.vmem [shape: f32[1,128], index: 6, kind: input, shape index: {}]   ;;  %s1015_s7 = inlined_call_operand.vmem [shape: f32[1,128], index: 7, kind: input, shape index: {}]   ;;  %s1016_s8 = inlined_call_operand.vmem [shape: f32[1,128], index: 8, kind: input, shape index: {}]   ;;  %s1017_s9 = inlined_call_operand.hbm [shape: f32[128,128], index: 9, kind: input, shape index: {}]   ;;  %s1018_s10 = inlined_call_operand.vmem [shape: f32[1,128], index: 10, kind: input, shape index: {}]   ;;  %s1019_s11 = inlined_call_operand.hbm [shape: f32[8,128], index: 11, kind: output, shape index: {}]  }
   0x1   :  { %17 = vsyncpa [#allocation6], 0 }
   0x2   :  { %18 = vsyncpa [#allocation9], 0 }
   0x3   :  { %19 = vsyncpa [#allocation4], 0  ;;  %s821_s17 = smov [#allocation5]   ;;  %s703_s21 = scalar_lea.hbm %s1009_s1, 2048 }
   0x4   :  { %s35_s18 = sshll.u32 %s821_s17, 4  ;;  %p704_p0 = scmp.ne.s32.totalorder %s1009_s1, %s703_s21  ;;  %s36_s18 = int_to_ptr.vmem [resolvable:$true] %s35_s18 }
   0x5   :  { %p707_p1 = scmp.lt.u32.totalorder %s703_s21, %s1009_s1 }
   0x7   :  { %p709_p2 = pnand %p707_p1, %p704_p0 }
   0x9   :  { %712 = shalt.err (!%p709_p2)
}
   0xa   :  { %s713_s26 = scalar_lea.vmem %s36_s18, 2048  ;;  %p718_p4 = scmp.lt.s32.totalorder %s36_s18, %s36_s18 }
   0xb   :  { %p714_p3 = scmp.ne.s32.totalorder %s36_s18, %s713_s26  ;;  %p719_p5 = scmp.lt.s32.totalorder %s713_s26, %s713_s26 }
   0xd   :  { %p720_p6 = por %p719_p5, %p718_p4 }
   0xf   :  { %p721_p7 = pnand %p720_p6, %p714_p3 }
  0x11   :  { %724 = shalt.err (!%p721_p7)
}
  0x12   :  { %s822_s27 = smov 128   ;;  %s823_s28 = smov 8  }
  0x13   :  { %41 = dma.hbm_to_vmem [thread:$0]  %s1009_s1, 2048, %s36_s18, [#allocation6], %s822_s27, %s822_s27, %s823_s28  }
  0x14   :  { %s824_s12 = smov [#allocation2]   ;;  %s825_s14 = smov [#allocation7]  }
  0x15   :  { %s26_s13 = sshll.u32 %s824_s12, 4  ;;  %s53_s15 = sshll.u32 %s825_s14, 4  ;;  %s27_s13 = int_to_ptr.vmem [resolvable:$true] %s26_s13  ;;  %s54_s15 = int_to_ptr.vmem [resolvable:$true] %s53_s15 }
  0x16   :  { %s725_s19 = scalar_lea.hbm %s1008_s0, 128 }
  0x17   :  { %p726_p8 = scmp.ne.s32.totalorder %s1008_s0, %s725_s19  ;;  %p729_p9 = scmp.lt.u32.totalorder %s725_s19, %s1008_s0 }
  0x19   :  { %p731_p10 = pnand %p729_p9, %p726_p8 }
  0x1b   :  { %734 = shalt.err (!%p731_p10)
}
  0x1c   :  { %s735_s1 = scalar_lea.vmem %s27_s13, 128  ;;  %p740_p12 = scmp.lt.s32.totalorder %s27_s13, %s27_s13 }
  0x1d   :  { %p736_p11 = scmp.ne.s32.totalorder %s27_s13, %s735_s1  ;;  %p741_p13 = scmp.lt.s32.totalorder %s735_s1, %s735_s1 }
  0x1f   :  { %p742_p0 = por %p741_p13, %p740_p12 }
  0x21   :  { %p743_p1 = pnand %p742_p0, %p736_p11 }
  0x23   :  { %746 = shalt.err (!%p743_p1)
}
  0x24   :  { %29 = dma.hbm_to_vmem [thread:$0]  %s1008_s0, 128, %s27_s13, [#allocation3]  }
  0x25   :  { %s747_s29 = scalar_lea.hbm %s1013_s5, 2048 }
  0x26   :  { %p748_p2 = scmp.ne.s32.totalorder %s1013_s5, %s747_s29  ;;  %p751_p3 = scmp.lt.u32.totalorder %s747_s29, %s1013_s5 }
  0x28   :  { %p753_p4 = pnand %p751_p3, %p748_p2 }
  0x2a   :  { %756 = shalt.err (!%p753_p4)
}
  0x2b   :  { %s757_s17 = scalar_lea.vmem %s54_s15, 2048  ;;  %p762_p6 = scmp.lt.s32.totalorder %s54_s15, %s54_s15 }
  0x2c   :  { %p758_p5 = scmp.ne.s32.totalorder %s54_s15, %s757_s17  ;;  %p763_p7 = scmp.lt.s32.totalorder %s757_s17, %s757_s17 }
  0x2e   :  { %p764_p8 = por %p763_p7, %p762_p6 }
  0x30   :  { %p765_p9 = pnand %p764_p8, %p758_p5 }
  0x32   :  { %768 = shalt.err (!%p765_p9)
}
  0x33   :  { %59 = dma.hbm_to_vmem [thread:$0]  %s1013_s5, 2048, %s54_s15, [#allocation6], %s822_s27, %s822_s27, %s823_s28  }
  0x34   :  { %s826_s19 = smov [#allocation8]   ;;  %s769_s23 = scalar_lea.hbm %s1017_s9, 2048 }
  0x35   :  { %s71_s20 = sshll.u32 %s826_s19, 4  ;;  %p770_p10 = scmp.ne.s32.totalorder %s1017_s9, %s769_s23  ;;  %s72_s20 = int_to_ptr.vmem [resolvable:$true] %s71_s20 }
  0x36   :  { %p773_p11 = scmp.lt.u32.totalorder %s769_s23, %s1017_s9 }
  0x38   :  { %p775_p12 = pnand %p773_p11, %p770_p10 }
  0x3a   :  { %778 = shalt.err (!%p775_p12)
}
  0x3b   :  { %s779_s26 = scalar_lea.vmem %s72_s20, 2048  ;;  %p784_p0 = scmp.lt.s32.totalorder %s72_s20, %s72_s20 }
  0x3c   :  { %p780_p13 = scmp.ne.s32.totalorder %s72_s20, %s779_s26  ;;  %p785_p1 = scmp.lt.s32.totalorder %s779_s26, %s779_s26 }
  0x3e   :  { %p786_p2 = por %p785_p1, %p784_p0 }
  0x40   :  { %p787_p3 = pnand %p786_p2, %p780_p13 }
  0x42   :  { %790 = shalt.err (!%p787_p3)
}
  0x43   :  { %77 = dma.hbm_to_vmem [thread:$0]  %s1017_s9, 2048, %s72_s20, [#allocation9], %s822_s27, %s822_s27, %s823_s28  }
  0x44   :  { %813 = dma.done.wait [#allocation3], 128  }
  0x45   :  { %814 = vsyncadd [#allocation3], 4294967168 }
  0x46   :  { %815 = dma.done.wait [#allocation6], 4096  }
  0x47   :  { %816 = vsyncadd [#allocation6], 4294963200 }
  0x48   :  { %817 = dma.done.wait [#allocation9], 2048  }
  0x49   :  { %818 = vsyncadd [#allocation9], 4294965248  ;;  %v827_v0 = vmov 0.0|0.0   ;;  %vm828_vm0 = vmmov 0   ;;  %v829_v1 = vmov 0.0   ;;  %v93_v2 = vld [vmem:[#allocation5] sm:$0xff] }
  0x4a   :  { %615 = vmatprep.subr.bf16.mxu0 %v827_v0  ;;  %542 = vmatprep.mubr.msk.f32.mxu0 %vm828_vm0, %v829_v1  ;;  %v94_v3 = vld [vmem:[#allocation5 + $0x8] sm:$0xff]  ;;  %v95_v4 = vld [vmem:[#allocation5 + $0x10] sm:$0xff]  ;;  %v96_v6 = vld [vmem:[#allocation5 + $0x18] sm:$0xff]  ;;  %s830_s13 = smov [#allocation10]  }
  0x4b   :  { %639 = vmatprep.subr.bf16.mxu1 %v827_v0  ;;  %577 = vmatprep.mubr.msk.f32.mxu1 %vm828_vm0, %v829_v1  ;;  %v616_v5 = vpack.c.bf16 %v94_v3, %v93_v2  ;;  %v619_v7 = vpack.c.bf16 %v96_v6, %v95_v4  ;;  %v97_v8 = vld [vmem:[#allocation5 + $0x20] sm:$0xff]  ;;  %v98_v9 = vld [vmem:[#allocation5 + $0x28] sm:$0xff]  ;;  %v99_v11 = vld [vmem:[#allocation5 + $0x30] sm:$0xff]  ;;  %s441_s19 = sshll.u32 %s830_s13, 4  ;;  %s442_s19 = int_to_ptr.vmem [resolvable:$true] %s441_s19 }
  0x4c   :  { %v622_v10 = vpack.c.bf16 %v98_v9, %v97_v8  ;;  %v100_v12 = vld [vmem:[#allocation5 + $0x38] sm:$0xff]  ;;  %v101_v14 = vld [vmem:[#allocation5 + $0x40] sm:$0xff]  ;;  %v102_v15 = vld [vmem:[#allocation5 + $0x48] sm:$0xff]  ;;  %p796_p5 = scmp.lt.s32.totalorder %s442_s19, %s442_s19 }
  0x4d   :  { %617 = vmatpush3.bf16.msra.mxu0 %v616_v5  ;;  %v625_v13 = vpack.c.bf16 %v100_v12, %v99_v11  ;;  %v628_v16 = vpack.c.bf16 %v102_v15, %v101_v14  ;;  %v103_v17 = vld [vmem:[#allocation5 + $0x50] sm:$0xff]  ;;  %v104_v18 = vld [vmem:[#allocation5 + $0x58] sm:$0xff]  ;;  %v105_v20 = vld [vmem:[#allocation5 + $0x60] sm:$0xff] }
  0x4e   :  { %618 = vmatprep.subr.bf16.mxu0 %v827_v0  ;;  %v631_v19 = vpack.c.bf16 %v104_v18, %v103_v17  ;;  %v106_v21 = vld [vmem:[#allocation5 + $0x68] sm:$0xff]  ;;  %v107_v23 = vld [vmem:[#allocation5 + $0x70] sm:$0xff]  ;;  %v108_v24 = vld [vmem:[#allocation5 + $0x78] sm:$0xff] }
  0x4f   :  { %v634_v22 = vpack.c.bf16 %v106_v21, %v105_v20  ;;  %v637_v25 = vpack.c.bf16 %v108_v24, %v107_v23  ;;  %v92_v26 = vld [vmem:[#allocation2] sm:$0xff]  ;;  %v217_v27 = vld [vmem:[#allocation7] sm:$0xff]  ;;  %v218_v28 = vld [vmem:[#allocation7 + $0x8] sm:$0xff] }
  0x50   :  { %v640_v29 = vpack.c.bf16 %v218_v28, %v217_v27  ;;  %v452_v30 = vld [vmem:[%s1010_s2] ss:$0 sm:$0xff]  ;;  %v219_v36 = vld [vmem:[#allocation7 + $0x10] sm:$0xff]  ;;  %v221_v39 = vld [vmem:[#allocation7 + $0x20] sm:$0xff] }
  0x51   :  { %620 = vmatpush3.bf16.msra.mxu0 %v619_v7  ;;  %v220_v37 = vld [vmem:[#allocation7 + $0x18] sm:$0xff]  ;;  %v222_v40 = vld [vmem:[#allocation7 + $0x28] sm:$0xff]  ;;  %v223_v42 = vld [vmem:[#allocation7 + $0x30] sm:$0xff] }
  0x52   :  { %621 = vmatprep.subr.bf16.mxu0 %v827_v0  ;;  %641 = vmatpush3.bf16.msra.mxu1 %v640_v29  ;;  %v643_v38 = vpack.c.bf16 %v220_v37, %v219_v36  ;;  %v646_v41 = vpack.c.bf16 %v222_v40, %v221_v39  ;;  %v224_v43 = vld [vmem:[#allocation7 + $0x38] sm:$0xff]  ;;  %v225_v45 = vld [vmem:[#allocation7 + $0x40] sm:$0xff]  ;;  %v226_v46 = vld [vmem:[#allocation7 + $0x48] sm:$0xff] }
  0x53   :  { %642 = vmatprep.subr.bf16.mxu1 %v827_v0  ;;  %v649_v44 = vpack.c.bf16 %v224_v43, %v223_v42  ;;  %v652_v47 = vpack.c.bf16 %v226_v46, %v225_v45  ;;  %v227_v48 = vld [vmem:[#allocation7 + $0x50] sm:$0xff]  ;;  %v228_v49 = vld [vmem:[#allocation7 + $0x58] sm:$0xff]  ;;  %v229_v51 = vld [vmem:[#allocation7 + $0x60] sm:$0xff] }
  0x54   :  { %v655_v50 = vpack.c.bf16 %v228_v49, %v227_v48  ;;  %v230_v52 = vld [vmem:[#allocation7 + $0x68] sm:$0xff]  ;;  %v231_v54 = vld [vmem:[#allocation7 + $0x70] sm:$0xff]  ;;  %v232_v55 = vld [vmem:[#allocation7 + $0x78] sm:$0xff] }
  0x55   :  { %623 = vmatpush3.bf16.msra.mxu0 %v622_v10  ;;  %v658_v53 = vpack.c.bf16 %v230_v52, %v229_v51  ;;  %v661_v56 = vpack.c.bf16 %v232_v55, %v231_v54  ;;  %v453_v3 = vld [vmem:[%s1011_s3] ss:$0 sm:$0xff]  ;;  %v340_v8 = vld [vmem:[#allocation8] sm:$0xff]  ;;  %v341_v9 = vld [vmem:[#allocation8 + $0x8] sm:$0xff] }
  0x56   :  { %624 = vmatprep.subr.bf16.mxu0 %v827_v0  ;;  %644 = vmatpush3.bf16.msra.mxu1 %v643_v38  ;;  %v454_v5 = vld [vmem:[%s1012_s4] ss:$0 sm:$0xff]  ;;  %v664_v10 = vpack.c.bf16 %v341_v9, %v340_v8  ;;  %v342_v17 = vld [vmem:[#allocation8 + $0x10] sm:$0xff]  ;;  %v344_v20 = vld [vmem:[#allocation8 + $0x20] sm:$0xff] }
  0x57   :  { %645 = vmatprep.subr.bf16.mxu1 %v827_v0  ;;  %v455_v11 = vld [vmem:[%s1014_s6] ss:$0 sm:$0xff]  ;;  %v345_v21 = vld [vmem:[#allocation8 + $0x28] sm:$0xff]  ;;  %v346_v23 = vld [vmem:[#allocation8 + $0x30] sm:$0xff] }
  0x58   :  { %v343_v18 = vld [vmem:[#allocation8 + $0x18] sm:$0xff]  ;;  %v349_v27 = vld [vmem:[#allocation8 + $0x48] sm:$0xff]  ;;  %v350_v29 = vld [vmem:[#allocation8 + $0x50] sm:$0xff] }
  0x59   :  { %626 = vmatpush3.bf16.msra.mxu0 %v625_v13  ;;  %v347_v24 = vld [vmem:[#allocation8 + $0x38] sm:$0xff] }
  0x5a   :  { %627 = vmatprep.subr.bf16.mxu0 %v827_v0  ;;  %647 = vmatpush3.bf16.msra.mxu1 %v646_v41  ;;  %v355_v36 = vld [vmem:[#allocation8 + $0x78] sm:$0xff] }
  0x5b   :  { %648 = vmatprep.subr.bf16.mxu1 %v827_v0  ;;  %v458_v51 = vld [vmem:[%s1018_s10] ss:$0 sm:$0xff] }
  0x5d   :  { %629 = vmatpush3.bf16.msra.mxu0 %v628_v16 }
  0x5e   :  { %630 = vmatprep.subr.bf16.mxu0 %v827_v0  ;;  %650 = vmatpush3.bf16.msra.mxu1 %v649_v44 }
  0x5f   :  { %651 = vmatprep.subr.bf16.mxu1 %v827_v0 }
  0x61   :  { %632 = vmatpush3.bf16.msra.mxu0 %v631_v19  ;;  %v667_v19 = vpack.c.bf16 %v343_v18, %v342_v17 }
  0x62   :  { %633 = vmatprep.subr.bf16.mxu0 %v827_v0  ;;  %653 = vmatpush3.bf16.msra.mxu1 %v652_v47  ;;  %v456_v47 = vld [vmem:[%s1015_s7] ss:$0 sm:$0xff]  ;;  %s791_s7 = scalar_lea.vmem %s442_s19, 128 }
  0x63   :  { %654 = vmatprep.subr.bf16.mxu1 %v827_v0  ;;  %p792_p4 = scmp.ne.s32.totalorder %s442_s19, %s791_s7  ;;  %p797_p6 = scmp.lt.s32.totalorder %s791_s7, %s791_s7 }
  0x65   :  { %635 = vmatpush3.bf16.msra.mxu0 %v634_v22  ;;  %v670_v22 = vpack.c.bf16 %v345_v21, %v344_v20  ;;  %p798_p7 = por %p797_p6, %p796_p5 }
  0x66   :  { %636 = vmatprep.subr.bf16.mxu0 %v827_v0  ;;  %656 = vmatpush3.bf16.msra.mxu1 %v655_v50 }
  0x67   :  { %657 = vmatprep.subr.bf16.mxu1 %v827_v0  ;;  %p799_p8 = pnand %p798_p7, %p792_p4 }
  0x69   :  { %638 = vmatpush3.bf16.msra.mxu0 %v637_v25  ;;  %v673_v25 = vpack.c.bf16 %v347_v24, %v346_v23 }
  0x6a   :  { %663 = vmatprep.subr.bf16.mxu0 %v827_v0  ;;  %659 = vmatpush3.bf16.msra.mxu1 %v658_v53 }
  0x6b   :  { %660 = vmatprep.subr.bf16.mxu1 %v827_v0 }
  0x6c   :  { %543 = vmatmul.mubr.f32.vlgmr.msra.gmra.mrb[0].mxu0 %v92_v26  ;;  %v348_v26 = vld [vmem:[#allocation8 + $0x40] sm:$0xff] }
  0x6d   :  { %612 = vmatprep.mubr.msk.f32.mxu0 %vm828_vm0, %v829_v1  ;;  %665 = vmatpush3.bf16.msra.mxu0 %v664_v10  ;;  %v676_v28 = vpack.c.bf16 %v349_v27, %v348_v26 }
  0x6e   :  { %662 = vmatpush3.bf16.msra.mxu1 %v661_v56  ;;  %666 = vmatprep.subr.bf16.mxu0 %v827_v0 }
  0x71   :  { %668 = vmatpush3.bf16.msra.mxu0 %v667_v19 }
  0x72   :  { %669 = vmatprep.subr.bf16.mxu0 %v827_v0 }
  0x75   :  { %671 = vmatpush3.bf16.msra.mxu0 %v670_v22 }
  0x76   :  { %672 = vmatprep.subr.bf16.mxu0 %v827_v0 }
  0x79   :  { %674 = vmatpush3.bf16.msra.mxu0 %v673_v25 }
  0x7a   :  { %675 = vmatprep.subr.bf16.mxu0 %v827_v0 }
  0x7d   :  { %677 = vmatpush3.bf16.msra.mxu0 %v676_v28 }
  0x7e   :  { %678 = vmatprep.subr.bf16.mxu0 %v827_v0 }
 0x13f   :  { %v184_v31 = vpop.f32.mrb[0].mxu0 }
 0x140   :  { %v185_v32 = vadd.f32 %v452_v30, %v184_v31  ;;  %v544_v33 = vpop.f32.mrb[1].mxu0  ;;  %v351_v30 = vld [vmem:[#allocation8 + $0x58] sm:$0xff] }
 0x141   :  { %v679_v31 = vpack.c.bf16 %v351_v30, %v350_v29  ;;  %v353_v33 = vld [vmem:[#allocation8 + $0x68] sm:$0xff] }
 0x142   :  { %v188_v34 = vmax.f32 %v185_v32, 0.0  ;;  %v352_v32 = vld [vmem:[#allocation8 + $0x60] sm:$0xff] }
 0x143   :  { %680 = vmatpush3.bf16.msra.mxu0 %v679_v31 }
 0x144   :  { %189 = vadd.xlane.f32.xlu0 %v188_v34  ;;  %v193_v35 = vmul.f32 %v188_v34, %v188_v34  ;;  %681 = vmatprep.subr.bf16.mxu0 %v827_v0 }
 0x148   :  { %194 = vadd.xlane.f32.xlu0 %v193_v35  ;;  %v354_v35 = vld [vmem:[#allocation8 + $0x70] sm:$0xff] }
 0x149   :  { %v685_v37 = vpack.c.bf16 %v355_v36, %v354_v35 }
 0x1d1   :  { %v190_v57 = vpop.xlane.xlu0 %189 }
 0x1d2   :  { %v192_v58 = vmul.f32 0.03125, %v190_v57 }
 0x1d4   :  { %v197_v60 = vmul.f32 %v192_v58, %v192_v58  ;;  %v199_v1 = vsub.f32 %v188_v34, %v192_v58  ;;  %v682_v34 = vpack.c.bf16 %v353_v33, %v352_v32 }
 0x1d5   :  { %v195_v59 = vpop.xlane.xlu0 %194 }
 0x1d6   :  { %v196_v61 = vmul.f32 0.03125, %v195_v59  ;;  %683 = vmatpush3.bf16.msra.mxu0 %v682_v34 }
 0x1d7   :  { %684 = vmatprep.subr.bf16.mxu0 %v827_v0  ;;  %v457_v0 = vld [vmem:[%s1016_s8] ss:$0 sm:$0xff] }
 0x1d8   :  { %v198_v62 = vsub.f32 %v196_v61, %v197_v60 }
 0x1da   :  { %v200_v63 = vadd.f32 1e-05, %v198_v62  ;;  %686 = vmatpush3.bf16.msra.mxu0 %v685_v37 }
 0x1dc   :  { %697 = vrsqrt.f32 %v200_v63 }
 0x1e6   :  { %v698_v2 = vpop.eup %697 }
 0x1e7   :  { %v202_v4 = vmul.f32 %v698_v2, %v199_v1 }
 0x1e9   :  { %v209_v6 = vmul.f32 %v453_v3, %v202_v4 }
 0x1eb   :  { %v216_v7 = vadd.f32 %v454_v5, %v209_v6 }
 0x1ed   :  { %578 = vmatmul.mubr.f32.vlgmr.msra.gmra.mrb[0].mxu1 %v216_v7 }
 0x2c0   :  { %v308_v12 = vpop.f32.mrb[0].mxu1 }
 0x2c1   :  { %v309_v13 = vadd.f32 %v455_v11, %v308_v12  ;;  %v579_v14 = vpop.f32.mrb[1].mxu1 }
 0x2c3   :  { %v312_v15 = vmax.f32 %v309_v13, 0.0 }
 0x2c5   :  { %313 = vadd.xlane.f32.xlu1 %v312_v15  ;;  %v316_v16 = vmul.f32 %v312_v15, %v312_v15 }
 0x2c9   :  { %317 = vadd.xlane.f32.xlu1 %v316_v16 }
 0x352   :  { %v314_v38 = vpop.xlane.xlu1 %313 }
 0x353   :  { %v315_v39 = vmul.f32 0.03125, %v314_v38 }
 0x355   :  { %v320_v41 = vmul.f32 %v315_v39, %v315_v39  ;;  %v322_v45 = vsub.f32 %v312_v15, %v315_v39 }
 0x356   :  { %v318_v40 = vpop.xlane.xlu1 %317 }
 0x357   :  { %v319_v42 = vmul.f32 0.03125, %v318_v40 }
 0x359   :  { %v321_v43 = vsub.f32 %v319_v42, %v320_v41 }
 0x35b   :  { %v323_v44 = vadd.f32 1e-05, %v321_v43 }
 0x35d   :  { %699 = vrsqrt.f32 %v323_v44 }
 0x367   :  { %v700_v46 = vpop.eup %699 }
 0x368   :  { %v325_v48 = vmul.f32 %v700_v46, %v322_v45 }
 0x36a   :  { %v332_v49 = vmul.f32 %v456_v47, %v325_v48 }
 0x36c   :  { %v339_v50 = vadd.f32 %v457_v0, %v332_v49 }
 0x36e   :  { %613 = vmatmul.mubr.f32.vlgmr.msra.gmra.mrb[2].mxu0 %v339_v50 }
 0x441   :  { %v429_v52 = vpop.f32.mrb[2].mxu0 }
 0x442   :  { %v430_v53 = vadd.f32 %v458_v51, %v429_v52  ;;  %v614_v54 = vpop.f32.mrb[3].mxu0 }
 0x444   :  { %701 = vtanh.f32 %v430_v53 }
 0x44e   :  { %v702_v55 = vpop.eup %701 }
 0x44f   :  { %434 = vst [vmem:[#allocation10] sm:$0xff] %v702_v55 }
 0x450   :  { %802 = shalt.err (!%p799_p8)
}
 0x451   :  { %s803_s10 = scalar_lea.hbm %s1019_s11, 128 }
 0x452   :  { %p804_p9 = scmp.ne.s32.totalorder %s1019_s11, %s803_s10  ;;  %p807_p10 = scmp.lt.u32.totalorder %s803_s10, %s1019_s11 }
 0x454   :  { %p809_p11 = pnand %p807_p10, %p804_p9 }
 0x456   :  { %812 = shalt.err (!%p809_p11)
}
 0x457   :  { %444 = dma.vmem_to_hbm [thread:$0]  %s442_s19, 128, %s1019_s11, [#allocation4]  }
 0x458   :  { %819 = dma.done.wait [#allocation4], 128  }
 0x459   :  { %820 = vsyncadd [#allocation4], 4294967168 }
 0x45a   :  { %448 = vsyncpa [#allocation3], 1 }
 0x45b   :  { %449 = vsyncpa [#allocation6], 1 }
 0x45c   :  { %450 = vsyncpa [#allocation9], 1 }
 0x45d   :  { %451 = vsyncpa [#allocation4], 1 }

</bundles_post_ra>
